<compile_context>
chip_gen: v7x
topology: tpu7x:2x2x1
jax: 0.10.0
libtpu: 0.0.40
codegen_flags: <defaults>
</compile_context>

<pallas_src>
import numpy as np
import jax
import jax.numpy as jnp
from jax import lax
from jax.experimental import pallas as pl
from jax.experimental.pallas import tpu as pltpu

NEG_SLOPE = 0.01          # nn.LeakyReLU() default negative_slope
KERNEL_SIZE = 3
PADDING = 1               # module hard-codes padding=1 for every layer
DILATIONS = (1, 2, 3, 2, 1)
LANES = 128               # vreg lane width; the padded 11x11 plane (121) fits


def _layer_sizes(H):
    """Spatial edge after each conv (padding=1 -> dilated convs shrink)."""
    sizes, h = [], H
    for d in DILATIONS:
        h = h + 2 * PADDING - d * (KERNEL_SIZE - 1)
        sizes.append(h)
    return sizes


def _make_fused_kernel(B, C, H, W):
    """Fused kernel: 5 dilated convs + LeakyReLUs + residual, one invocation."""
    R = B * C                         # rows (sublanes) of every slab
    S = H + 2 * PADDING               # padded plane edge (11); canvas = S*S lanes
    n_layers = len(DILATIONS)
    center = PADDING * S + PADDING    # flattened lane index of plane pos (1,1)

    def kernel(canvas_ref, x_ref, wbig_ref, bias_ref, mask_ref, o_ref):
        # Invariant before layer l: `canvas` holds the layer-l input at plane
        # offset (1,1) and zeros everywhere else == the zero-padded conv input.
        canvas = canvas_ref[...]                                      # (R, LANES)

        for l, d in enumerate(DILATIONS):
            # 9 shifted taps via lane rotation (XLU slot, cheap).  Wraparound
            # only lands on lanes that the mask below zeroes out.
            taps = []
            for ky in range(KERNEL_SIZE):
                for kx in range(KERNEL_SIZE):
                    delta = (ky * d - PADDING) * S + (kx * d - PADDING)
                    shift = (-delta) % LANES
                    taps.append(canvas if shift == 0
                                else pltpu.roll(canvas, shift=shift, axis=1))
            tap_stack = jnp.concatenate(taps, axis=0)                 # (9R, LANES)

            # One MXU matmul per layer: block-diagonal (per-batch) channel mix
            # over all 9 taps at once.  Replaces ~288 VALU MACs/layer.
            out = jnp.dot(wbig_ref[l], tap_stack,
                          preferred_element_type=jnp.float32)          # (R, LANES)
            out = out + bias_ref[l]

            if l < n_layers - 1:
                out = jnp.where(out >= 0, out, NEG_SLOPE * out)        # LeakyReLU
                # Re-establish the zero border / clear roll garbage: one VPU
                # multiply by a precomputed 0/1 mask (no masked stores).
                canvas = out * mask_ref[l]
            else:
                canvas = out

        # Residual: model(x) + x.  The chain output is 1x1 (plane pos (1,1)),
        # broadcast against the full (H, W) plane exactly as torch does.
        final = canvas[:, center:center + 1]                           # (R, 1)
        o_ref[...] = x_ref[...] + final                                # one dense store

    return kernel


def prepare_params(params, B, C, H, W):
    """Precompute lane-dense kernel operands once (reused every call).

    Returns:
      wbig:  (L, B*C, 9*B*C) block-diagonal weights -> one MXU matmul per layer
      bias:  (L, B*C, 128)   per-row bias, pre-broadcast along lanes
      masks: (L, B*C, 128)   0/1 valid-output-window masks (zero-border re-init)
    """
    n = len(DILATIONS)
    R = B * C
    S = H + 2 * PADDING
    assert S * S <= LANES
    sizes = _layer_sizes(H)

    wbig = np.zeros((n, R, 9 * R), np.float32)
    bias = np.zeros((n, R, LANES), np.float32)
    masks = np.zeros((n, R, LANES), np.float32)
    for l, (w, b) in enumerate(params):
        w = np.asarray(w, np.float32)        # (C_out, C_in, 3, 3)
        b = np.asarray(b, np.float32)        # (C_out,)
        for bi in range(B):
            for co in range(C):
                row = bi * C + co
                bias[l, row, :] = b[co]
                for ci in range(C):
                    for ky in range(KERNEL_SIZE):
                        for kx in range(KERNEL_SIZE):
                            t = ky * KERNEL_SIZE + kx
                            wbig[l, row, t * R + bi * C + ci] = w[co, ci, ky, kx]
        hw = sizes[l]                         # valid output window after layer l
        for p in range(1, hw + 1):
            masks[l, :, p * S + 1: p * S + 1 + hw] = 1.0
    return jnp.asarray(wbig), jnp.asarray(bias), jnp.asarray(masks)


def dilated_resblock(x, wbig, bias, masks):
    """Pallas implementation of DilatedResblock.forward (x: (B, C, H, W))."""
    B, C, H, W = x.shape
    # padding=1 + dilations (1,2,3,2,1) shrink H,W by 8; the `model(x) + x`
    # residual only broadcasts like torch when the chain output is 1x1.
    assert H == 9 and W == 9, "DilatedResblock residual broadcast requires H == W == 9"
    R = B * C
    S = H + 2 * PADDING
    assert wbig.shape == (len(DILATIONS), R, 9 * R)

    x32 = x.astype(jnp.float32)
    # Lane-dense layouts (wrapper-side layout plumbing only):
    #   x_slab:  (B*C, H*W)  -> residual add + single dense final store
    #   canvas0: (B*C, 128)  -> zero-padded 11x11 plane flattened to lanes
    x_slab = x32.reshape(R, H * W)
    canvas0 = jnp.pad(x32, ((0, 0), (0, 0), (PADDING, PADDING), (PADDING, PADDING)))
    canvas0 = canvas0.reshape(R, S * S)
    canvas0 = jnp.pad(canvas0, ((0, 0), (0, LANES - S * S)))

    kernel = _make_fused_kernel(B, C, H, W)
    flops = 2 * len(DILATIONS) * R * LANES * (9 * R)
    bytes_accessed = 4 * (canvas0.size + x_slab.size + wbig.size +
                          bias.size + masks.size + R * H * W)

    # Working set is ~70 KiB: trivially within every generation's VMEM
    # (64 MiB v7x, 128 MiB v5e/v6e) -> no vmem_limit override.  If B*C or H
    # grow, re-derive the slab tiling against the default scoped limits first
    # and switch the block-diagonal matmul to per-batch (C, 9C) contractions.
    # A grid over B (to use both v7x TensorCores) is not worth the ~0.35us/step
    # pipeline overhead for this sub-microsecond body; fuse more blocks/layers
    # per call instead if more throughput is needed.
    out_slab = pl.pallas_call(
        kernel,
        out_shape=jax.ShapeDtypeStruct((R, H * W), jnp.float32),
        in_specs=[pl.BlockSpec(memory_space=pltpu.MemorySpace.VMEM)] * 5,
        out_specs=pl.BlockSpec(memory_space=pltpu.MemorySpace.VMEM),
        cost_estimate=pl.CostEstimate(flops=int(flops), transcendentals=0,
                                      bytes_accessed=int(bytes_accessed)),
    )(canvas0, x_slab, wbig, bias, masks)
    return out_slab.reshape(B, C, H, W)


def init_params(key, channels):
    """Deterministic synthetic parameters (PyTorch-like uniform init)."""
    params = []
    for _ in range(len(DILATIONS)):
        kw, kb, key = jax.random.split(key, 3)
        fan_in = channels * KERNEL_SIZE * KERNEL_SIZE
        bound = 1.0 / np.sqrt(fan_in)
        w = jax.random.uniform(kw, (channels, channels, KERNEL_SIZE, KERNEL_SIZE),
                               jnp.float32, -bound, bound)
        b = jax.random.uniform(kb, (channels,), jnp.float32, -bound, bound)
        params.append((w, b))
    return params


def reference(x, params):
    """Pure-JAX reference (mirrors the PyTorch forward exactly)."""
    h = x
    n = len(params)
    for i, (w, b) in enumerate(params):
        d = DILATIONS[i]
        h = lax.conv_general_dilated(
            h, w, window_strides=(1, 1),
            padding=((PADDING, PADDING), (PADDING, PADDING)),
            rhs_dilation=(d, d),
            dimension_numbers=("NCHW", "OIHW", "NCHW"),
            precision=lax.Precision.HIGHEST)
        h = h + b[None, :, None, None]
        if i < n - 1:
            h = jnp.where(h >= 0, h, NEG_SLOPE * h)
    return h + x


if __name__ == "__main__":
    key = jax.random.PRNGKey(0)
    kx_, kp = jax.random.split(key)

    B, C = 2, 4
    # H = W = 9: with padding=1 on every (dilated) conv, spatial size goes
    # 9 -> 9 -> 7 -> 3 -> 1 -> 1, and `model(x) + x` broadcasts (1,1) vs (9,9)
    # exactly as torch would.
    H = W = 9
    x = jax.random.normal(kx_, (B, C, H, W), jnp.float32)
    params = init_params(kp, C)
    wbig, bias, masks = prepare_params(params, B, C, H, W)   # built once, reused

    fwd = jax.jit(dilated_resblock)
    out = jax.block_until_ready(fwd(x, wbig, bias, masks))

    ref = reference(x, params)
    assert out.shape == (B, C, H, W), out.shape
    err = float(np.max(np.abs(np.asarray(out) - np.asarray(ref))))
    assert np.allclose(np.asarray(out), np.asarray(ref), rtol=5e-3, atol=5e-3), (
        "max abs err:", err)

    print("KERNEL_OK")
</pallas_src>

<mosaic_0001>
module attributes {stable_mosaic.version = 11 : i64} {
  func.func @kernel(%arg0: memref<8x128xf32, #tpu.memory_space<vmem>>, %arg1: memref<8x81xf32, #tpu.memory_space<vmem>>, %arg2: memref<5x8x72xf32, #tpu.memory_space<vmem>>, %arg3: memref<5x8x128xf32, #tpu.memory_space<vmem>>, %arg4: memref<5x8x128xf32, #tpu.memory_space<vmem>>, %arg5: memref<8x81xf32, #tpu.memory_space<vmem>>) attributes {dimension_semantics = [], scalar_prefetch = 0 : i64, scratch_operands = 0 : i64, tpu.core_type = #tpu.core_type<tc>} {
    %c0 = arith.constant 0 : index
    %c0_0 = arith.constant 0 : index
    %0 = vector.load %arg0[%c0, %c0_0] : memref<8x128xf32, #tpu.memory_space<vmem>>, vector<8x128xf32>
    %c12_i32 = arith.constant 12 : i32
    %1 = tpu.dynamic_rotate %0 by %c12_i32 dim 1 : vector<8x128xf32>, i32 -> vector<8x128xf32>
    %c11_i32 = arith.constant 11 : i32
    %2 = tpu.dynamic_rotate %0 by %c11_i32 dim 1 : vector<8x128xf32>, i32 -> vector<8x128xf32>
    %c10_i32 = arith.constant 10 : i32
    %3 = tpu.dynamic_rotate %0 by %c10_i32 dim 1 : vector<8x128xf32>, i32 -> vector<8x128xf32>
    %c1_i32 = arith.constant 1 : i32
    %4 = tpu.dynamic_rotate %0 by %c1_i32 dim 1 : vector<8x128xf32>, i32 -> vector<8x128xf32>
    %c127_i32 = arith.constant 127 : i32
    %5 = tpu.dynamic_rotate %0 by %c127_i32 dim 1 : vector<8x128xf32>, i32 -> vector<8x128xf32>
    %c118_i32 = arith.constant 118 : i32
    %6 = tpu.dynamic_rotate %0 by %c118_i32 dim 1 : vector<8x128xf32>, i32 -> vector<8x128xf32>
    %c117_i32 = arith.constant 117 : i32
    %7 = tpu.dynamic_rotate %0 by %c117_i32 dim 1 : vector<8x128xf32>, i32 -> vector<8x128xf32>
    %c116_i32 = arith.constant 116 : i32
    %8 = tpu.dynamic_rotate %0 by %c116_i32 dim 1 : vector<8x128xf32>, i32 -> vector<8x128xf32>
    %9 = tpu.concatenate %1, %2, %3, %4, %0, %5, %6, %7, %8 in 0 : vector<8x128xf32>, vector<8x128xf32>, vector<8x128xf32>, vector<8x128xf32>, vector<8x128xf32>, vector<8x128xf32>, vector<8x128xf32>, vector<8x128xf32>, vector<8x128xf32> -> vector<72x128xf32>
    %c0_1 = arith.constant 0 : index
    %c0_2 = arith.constant 0 : index
    %c0_3 = arith.constant 0 : index
    %10 = vector.load %arg2[%c0_1, %c0_2, %c0_3] : memref<5x8x72xf32, #tpu.memory_space<vmem>>, vector<1x8x72xf32>
    %11 = vector.shape_cast %10 : vector<1x8x72xf32> to vector<8x72xf32>
    %cst = arith.constant dense<0.000000e+00> : vector<8x128xf32>
    %12 = tpu.matmul %11, %9, %cst {dimension_numbers = #tpu.dot_dimension_numbers<[1], [0], [0], [1], [0, 0, 1, 1], [], []>} : vector<8x72xf32>, vector<72x128xf32>, vector<8x128xf32> -> vector<8x128xf32>
    %c0_4 = arith.constant 0 : index
    %c0_5 = arith.constant 0 : index
    %c0_6 = arith.constant 0 : index
    %13 = vector.load %arg3[%c0_4, %c0_5, %c0_6] : memref<5x8x128xf32, #tpu.memory_space<vmem>>, vector<1x8x128xf32>
    %14 = vector.shape_cast %13 : vector<1x8x128xf32> to vector<8x128xf32>
    %15 = arith.addf %12, %14 : vector<8x128xf32>
    %cst_7 = arith.constant 0.000000e+00 : f32
    %16 = vector.broadcast %cst_7 : f32 to vector<8x128xf32>
    %17 = arith.cmpf oge, %15, %16 : vector<8x128xf32>
    %cst_8 = arith.constant 0.00999999977 : f32
    %18 = vector.broadcast %cst_8 : f32 to vector<8x128xf32>
    %19 = arith.mulf %18, %15 : vector<8x128xf32>
    %20 = arith.select %17, %15, %19 : vector<8x128xi1>, vector<8x128xf32>
    %c0_9 = arith.constant 0 : index
    %c0_10 = arith.constant 0 : index
    %c0_11 = arith.constant 0 : index
    %21 = vector.load %arg4[%c0_9, %c0_10, %c0_11] : memref<5x8x128xf32, #tpu.memory_space<vmem>>, vector<1x8x128xf32>
    %22 = vector.shape_cast %21 : vector<1x8x128xf32> to vector<8x128xf32>
    %23 = arith.mulf %20, %22 : vector<8x128xf32>
    %c12_i32_12 = arith.constant 12 : i32
    %24 = tpu.dynamic_rotate %23 by %c12_i32_12 dim 1 : vector<8x128xf32>, i32 -> vector<8x128xf32>
    %c10_i32_13 = arith.constant 10 : i32
    %25 = tpu.dynamic_rotate %23 by %c10_i32_13 dim 1 : vector<8x128xf32>, i32 -> vector<8x128xf32>
    %c8_i32 = arith.constant 8 : i32
    %26 = tpu.dynamic_rotate %23 by %c8_i32 dim 1 : vector<8x128xf32>, i32 -> vector<8x128xf32>
    %c118_i32_14 = arith.constant 118 : i32
    %27 = tpu.dynamic_rotate %23 by %c118_i32_14 dim 1 : vector<8x128xf32>, i32 -> vector<8x128xf32>
    %c116_i32_15 = arith.constant 116 : i32
    %28 = tpu.dynamic_rotate %23 by %c116_i32_15 dim 1 : vector<8x128xf32>, i32 -> vector<8x128xf32>
    %c114_i32 = arith.constant 114 : i32
    %29 = tpu.dynamic_rotate %23 by %c114_i32 dim 1 : vector<8x128xf32>, i32 -> vector<8x128xf32>
    %c96_i32 = arith.constant 96 : i32
    %30 = tpu.dynamic_rotate %23 by %c96_i32 dim 1 : vector<8x128xf32>, i32 -> vector<8x128xf32>
    %c94_i32 = arith.constant 94 : i32
    %31 = tpu.dynamic_rotate %23 by %c94_i32 dim 1 : vector<8x128xf32>, i32 -> vector<8x128xf32>
    %c92_i32 = arith.constant 92 : i32
    %32 = tpu.dynamic_rotate %23 by %c92_i32 dim 1 : vector<8x128xf32>, i32 -> vector<8x128xf32>
    %33 = tpu.concatenate %24, %25, %26, %27, %28, %29, %30, %31, %32 in 0 : vector<8x128xf32>, vector<8x128xf32>, vector<8x128xf32>, vector<8x128xf32>, vector<8x128xf32>, vector<8x128xf32>, vector<8x128xf32>, vector<8x128xf32>, vector<8x128xf32> -> vector<72x128xf32>
    %c1 = arith.constant 1 : index
    %c0_16 = arith.constant 0 : index
    %c0_17 = arith.constant 0 : index
    %34 = vector.load %arg2[%c1, %c0_16, %c0_17] : memref<5x8x72xf32, #tpu.memory_space<vmem>>, vector<1x8x72xf32>
    %35 = vector.shape_cast %34 : vector<1x8x72xf32> to vector<8x72xf32>
    %cst_18 = arith.constant dense<0.000000e+00> : vector<8x128xf32>
    %36 = tpu.matmul %35, %33, %cst_18 {dimension_numbers = #tpu.dot_dimension_numbers<[1], [0], [0], [1], [0, 0, 1, 1], [], []>} : vector<8x72xf32>, vector<72x128xf32>, vector<8x128xf32> -> vector<8x128xf32>
    %c1_19 = arith.constant 1 : index
    %c0_20 = arith.constant 0 : index
    %c0_21 = arith.constant 0 : index
    %37 = vector.load %arg3[%c1_19, %c0_20, %c0_21] : memref<5x8x128xf32, #tpu.memory_space<vmem>>, vector<1x8x128xf32>
    %38 = vector.shape_cast %37 : vector<1x8x128xf32> to vector<8x128xf32>
    %39 = arith.addf %36, %38 : vector<8x128xf32>
    %cst_22 = arith.constant 0.000000e+00 : f32
    %40 = vector.broadcast %cst_22 : f32 to vector<8x128xf32>
    %41 = arith.cmpf oge, %39, %40 : vector<8x128xf32>
    %cst_23 = arith.constant 0.00999999977 : f32
    %42 = vector.broadcast %cst_23 : f32 to vector<8x128xf32>
    %43 = arith.mulf %42, %39 : vector<8x128xf32>
    %44 = arith.select %41, %39, %43 : vector<8x128xi1>, vector<8x128xf32>
    %c1_24 = arith.constant 1 : index
    %c0_25 = arith.constant 0 : index
    %c0_26 = arith.constant 0 : index
    %45 = vector.load %arg4[%c1_24, %c0_25, %c0_26] : memref<5x8x128xf32, #tpu.memory_space<vmem>>, vector<1x8x128xf32>
    %46 = vector.shape_cast %45 : vector<1x8x128xf32> to vector<8x128xf32>
    %47 = arith.mulf %44, %46 : vector<8x128xf32>
    %c12_i32_27 = arith.constant 12 : i32
    %48 = tpu.dynamic_rotate %47 by %c12_i32_27 dim 1 : vector<8x128xf32>, i32 -> vector<8x128xf32>
    %c9_i32 = arith.constant 9 : i32
    %49 = tpu.dynamic_rotate %47 by %c9_i32 dim 1 : vector<8x128xf32>, i32 -> vector<8x128xf32>
    %c6_i32 = arith.constant 6 : i32
    %50 = tpu.dynamic_rotate %47 by %c6_i32 dim 1 : vector<8x128xf32>, i32 -> vector<8x128xf32>
    %c107_i32 = arith.constant 107 : i32
    %51 = tpu.dynamic_rotate %47 by %c107_i32 dim 1 : vector<8x128xf32>, i32 -> vector<8x128xf32>
    %c104_i32 = arith.constant 104 : i32
    %52 = tpu.dynamic_rotate %47 by %c104_i32 dim 1 : vector<8x128xf32>, i32 -> vector<8x128xf32>
    %c101_i32 = arith.constant 101 : i32
    %53 = tpu.dynamic_rotate %47 by %c101_i32 dim 1 : vector<8x128xf32>, i32 -> vector<8x128xf32>
    %c74_i32 = arith.constant 74 : i32
    %54 = tpu.dynamic_rotate %47 by %c74_i32 dim 1 : vector<8x128xf32>, i32 -> vector<8x128xf32>
    %c71_i32 = arith.constant 71 : i32
    %55 = tpu.dynamic_rotate %47 by %c71_i32 dim 1 : vector<8x128xf32>, i32 -> vector<8x128xf32>
    %c68_i32 = arith.constant 68 : i32
    %56 = tpu.dynamic_rotate %47 by %c68_i32 dim 1 : vector<8x128xf32>, i32 -> vector<8x128xf32>
    %57 = tpu.concatenate %48, %49, %50, %51, %52, %53, %54, %55, %56 in 0 : vector<8x128xf32>, vector<8x128xf32>, vector<8x128xf32>, vector<8x128xf32>, vector<8x128xf32>, vector<8x128xf32>, vector<8x128xf32>, vector<8x128xf32>, vector<8x128xf32> -> vector<72x128xf32>
    %c2 = arith.constant 2 : index
    %c0_28 = arith.constant 0 : index
    %c0_29 = arith.constant 0 : index
    %58 = vector.load %arg2[%c2, %c0_28, %c0_29] : memref<5x8x72xf32, #tpu.memory_space<vmem>>, vector<1x8x72xf32>
    %59 = vector.shape_cast %58 : vector<1x8x72xf32> to vector<8x72xf32>
    %cst_30 = arith.constant dense<0.000000e+00> : vector<8x128xf32>
    %60 = tpu.matmul %59, %57, %cst_30 {dimension_numbers = #tpu.dot_dimension_numbers<[1], [0], [0], [1], [0, 0, 1, 1], [], []>} : vector<8x72xf32>, vector<72x128xf32>, vector<8x128xf32> -> vector<8x128xf32>
    %c2_31 = arith.constant 2 : index
    %c0_32 = arith.constant 0 : index
    %c0_33 = arith.constant 0 : index
    %61 = vector.load %arg3[%c2_31, %c0_32, %c0_33] : memref<5x8x128xf32, #tpu.memory_space<vmem>>, vector<1x8x128xf32>
    %62 = vector.shape_cast %61 : vector<1x8x128xf32> to vector<8x128xf32>
    %63 = arith.addf %60, %62 : vector<8x128xf32>
    %cst_34 = arith.constant 0.000000e+00 : f32
    %64 = vector.broadcast %cst_34 : f32 to vector<8x128xf32>
    %65 = arith.cmpf oge, %63, %64 : vector<8x128xf32>
    %cst_35 = arith.constant 0.00999999977 : f32
    %66 = vector.broadcast %cst_35 : f32 to vector<8x128xf32>
    %67 = arith.mulf %66, %63 : vector<8x128xf32>
    %68 = arith.select %65, %63, %67 : vector<8x128xi1>, vector<8x128xf32>
    %c2_36 = arith.constant 2 : index
    %c0_37 = arith.constant 0 : index
    %c0_38 = arith.constant 0 : index
    %69 = vector.load %arg4[%c2_36, %c0_37, %c0_38] : memref<5x8x128xf32, #tpu.memory_space<vmem>>, vector<1x8x128xf32>
    %70 = vector.shape_cast %69 : vector<1x8x128xf32> to vector<8x128xf32>
    %71 = arith.mulf %68, %70 : vector<8x128xf32>
    %c12_i32_39 = arith.constant 12 : i32
    %72 = tpu.dynamic_rotate %71 by %c12_i32_39 dim 1 : vector<8x128xf32>, i32 -> vector<8x128xf32>
    %c10_i32_40 = arith.constant 10 : i32
    %73 = tpu.dynamic_rotate %71 by %c10_i32_40 dim 1 : vector<8x128xf32>, i32 -> vector<8x128xf32>
    %c8_i32_41 = arith.constant 8 : i32
    %74 = tpu.dynamic_rotate %71 by %c8_i32_41 dim 1 : vector<8x128xf32>, i32 -> vector<8x128xf32>
    %c118_i32_42 = arith.constant 118 : i32
    %75 = tpu.dynamic_rotate %71 by %c118_i32_42 dim 1 : vector<8x128xf32>, i32 -> vector<8x128xf32>
    %c116_i32_43 = arith.constant 116 : i32
    %76 = tpu.dynamic_rotate %71 by %c116_i32_43 dim 1 : vector<8x128xf32>, i32 -> vector<8x128xf32>
    %c114_i32_44 = arith.constant 114 : i32
    %77 = tpu.dynamic_rotate %71 by %c114_i32_44 dim 1 : vector<8x128xf32>, i32 -> vector<8x128xf32>
    %c96_i32_45 = arith.constant 96 : i32
    %78 = tpu.dynamic_rotate %71 by %c96_i32_45 dim 1 : vector<8x128xf32>, i32 -> vector<8x128xf32>
    %c94_i32_46 = arith.constant 94 : i32
    %79 = tpu.dynamic_rotate %71 by %c94_i32_46 dim 1 : vector<8x128xf32>, i32 -> vector<8x128xf32>
    %c92_i32_47 = arith.constant 92 : i32
    %80 = tpu.dynamic_rotate %71 by %c92_i32_47 dim 1 : vector<8x128xf32>, i32 -> vector<8x128xf32>
    %81 = tpu.concatenate %72, %73, %74, %75, %76, %77, %78, %79, %80 in 0 : vector<8x128xf32>, vector<8x128xf32>, vector<8x128xf32>, vector<8x128xf32>, vector<8x128xf32>, vector<8x128xf32>, vector<8x128xf32>, vector<8x128xf32>, vector<8x128xf32> -> vector<72x128xf32>
    %c3 = arith.constant 3 : index
    %c0_48 = arith.constant 0 : index
    %c0_49 = arith.constant 0 : index
    %82 = vector.load %arg2[%c3, %c0_48, %c0_49] : memref<5x8x72xf32, #tpu.memory_space<vmem>>, vector<1x8x72xf32>
    %83 = vector.shape_cast %82 : vector<1x8x72xf32> to vector<8x72xf32>
    %cst_50 = arith.constant dense<0.000000e+00> : vector<8x128xf32>
    %84 = tpu.matmul %83, %81, %cst_50 {dimension_numbers = #tpu.dot_dimension_numbers<[1], [0], [0], [1], [0, 0, 1, 1], [], []>} : vector<8x72xf32>, vector<72x128xf32>, vector<8x128xf32> -> vector<8x128xf32>
    %c3_51 = arith.constant 3 : index
    %c0_52 = arith.constant 0 : index
    %c0_53 = arith.constant 0 : index
    %85 = vector.load %arg3[%c3_51, %c0_52, %c0_53] : memref<5x8x128xf32, #tpu.memory_space<vmem>>, vector<1x8x128xf32>
    %86 = vector.shape_cast %85 : vector<1x8x128xf32> to vector<8x128xf32>
    %87 = arith.addf %84, %86 : vector<8x128xf32>
    %cst_54 = arith.constant 0.000000e+00 : f32
    %88 = vector.broadcast %cst_54 : f32 to vector<8x128xf32>
    %89 = arith.cmpf oge, %87, %88 : vector<8x128xf32>
    %cst_55 = arith.constant 0.00999999977 : f32
    %90 = vector.broadcast %cst_55 : f32 to vector<8x128xf32>
    %91 = arith.mulf %90, %87 : vector<8x128xf32>
    %92 = arith.select %89, %87, %91 : vector<8x128xi1>, vector<8x128xf32>
    %c3_56 = arith.constant 3 : index
    %c0_57 = arith.constant 0 : index
    %c0_58 = arith.constant 0 : index
    %93 = vector.load %arg4[%c3_56, %c0_57, %c0_58] : memref<5x8x128xf32, #tpu.memory_space<vmem>>, vector<1x8x128xf32>
    %94 = vector.shape_cast %93 : vector<1x8x128xf32> to vector<8x128xf32>
    %95 = arith.mulf %92, %94 : vector<8x128xf32>
    %c12_i32_59 = arith.constant 12 : i32
    %96 = tpu.dynamic_rotate %95 by %c12_i32_59 dim 1 : vector<8x128xf32>, i32 -> vector<8x128xf32>
    %c11_i32_60 = arith.constant 11 : i32
    %97 = tpu.dynamic_rotate %95 by %c11_i32_60 dim 1 : vector<8x128xf32>, i32 -> vector<8x128xf32>
    %c10_i32_61 = arith.constant 10 : i32
    %98 = tpu.dynamic_rotate %95 by %c10_i32_61 dim 1 : vector<8x128xf32>, i32 -> vector<8x128xf32>
    %c1_i32_62 = arith.constant 1 : i32
    %99 = tpu.dynamic_rotate %95 by %c1_i32_62 dim 1 : vector<8x128xf32>, i32 -> vector<8x128xf32>
    %c127_i32_63 = arith.constant 127 : i32
    %100 = tpu.dynamic_rotate %95 by %c127_i32_63 dim 1 : vector<8x128xf32>, i32 -> vector<8x128xf32>
    %c118_i32_64 = arith.constant 118 : i32
    %101 = tpu.dynamic_rotate %95 by %c118_i32_64 dim 1 : vector<8x128xf32>, i32 -> vector<8x128xf32>
    %c117_i32_65 = arith.constant 117 : i32
    %102 = tpu.dynamic_rotate %95 by %c117_i32_65 dim 1 : vector<8x128xf32>, i32 -> vector<8x128xf32>
    %c116_i32_66 = arith.constant 116 : i32
    %103 = tpu.dynamic_rotate %95 by %c116_i32_66 dim 1 : vector<8x128xf32>, i32 -> vector<8x128xf32>
    %104 = tpu.concatenate %96, %97, %98, %99, %95, %100, %101, %102, %103 in 0 : vector<8x128xf32>, vector<8x128xf32>, vector<8x128xf32>, vector<8x128xf32>, vector<8x128xf32>, vector<8x128xf32>, vector<8x128xf32>, vector<8x128xf32>, vector<8x128xf32> -> vector<72x128xf32>
    %c4 = arith.constant 4 : index
    %c0_67 = arith.constant 0 : index
    %c0_68 = arith.constant 0 : index
    %105 = vector.load %arg2[%c4, %c0_67, %c0_68] : memref<5x8x72xf32, #tpu.memory_space<vmem>>, vector<1x8x72xf32>
    %106 = vector.shape_cast %105 : vector<1x8x72xf32> to vector<8x72xf32>
    %cst_69 = arith.constant dense<0.000000e+00> : vector<8x128xf32>
    %107 = tpu.matmul %106, %104, %cst_69 {dimension_numbers = #tpu.dot_dimension_numbers<[1], [0], [0], [1], [0, 0, 1, 1], [], []>} : vector<8x72xf32>, vector<72x128xf32>, vector<8x128xf32> -> vector<8x128xf32>
    %c4_70 = arith.constant 4 : index
    %c0_71 = arith.constant 0 : index
    %c0_72 = arith.constant 0 : index
    %108 = vector.load %arg3[%c4_70, %c0_71, %c0_72] : memref<5x8x128xf32, #tpu.memory_space<vmem>>, vector<1x8x128xf32>
    %109 = vector.shape_cast %108 : vector<1x8x128xf32> to vector<8x128xf32>
    %110 = arith.addf %107, %109 : vector<8x128xf32>
    %111 = vector.extract_strided_slice %110 {offsets = [0, 12], sizes = [8, 1], strides = [1, 1]} : vector<8x128xf32> to vector<8x1xf32>
    %c0_73 = arith.constant 0 : index
    %c0_74 = arith.constant 0 : index
    %112 = vector.load %arg1[%c0_73, %c0_74] : memref<8x81xf32, #tpu.memory_space<vmem>>, vector<8x81xf32>
    %113 = vector.broadcast %111 : vector<8x1xf32> to vector<8x81xf32>
    %114 = arith.addf %112, %113 : vector<8x81xf32>
    %c0_75 = arith.constant 0 : index
    %c0_76 = arith.constant 0 : index
    %115 = vector.load %arg5[%c0_75, %c0_76] : memref<8x81xf32, #tpu.memory_space<vmem>>, vector<8x81xf32>
    tpu.vector_store %arg5[%c0_75, %c0_76], %114 {strides = array<i32>} : memref<8x81xf32, #tpu.memory_space<vmem>>, vector<8x81xf32>,
    return
  }
}

</mosaic_0001>

<bundles_post_ra>
// kernel: dilated_resblock.1
= control target key start
LH: loop header
LB: loop body
LE: loop exit
PB: predicated region body
PF: predicated region fallthrough
CT: control target
= control target key end

     0   :  { %v785_v1 = vmov 0.0|0.0   ;;  %s786_s20 = smov 10   ;;  %s787_s21 = smov 12   ;;  %vm792_vm0 = vmmov 0   ;;  %v793_v2 = vmov 0.0   ;;  %vm39_vm1 = vcmask 588800   ;;  %s966_s0 = inlined_call_operand.vmem [shape: f32[8,128], index: 0, kind: input, shape index: {}]   ;;  %s967_s2 = inlined_call_operand.vmem [shape: f32[5,8,72], index: 2, kind: input, shape index: {}]   ;;  %s968_s3 = inlined_call_operand.vmem [shape: f32[5,8,128], index: 3, kind: input, shape index: {}]   ;;  %s969_s4 = inlined_call_operand.vmem [shape: f32[5,8,128], index: 4, kind: input, shape index: {}]   ;;  %s970_s1 = inlined_call_operand.vmem [shape: f32[8,81], index: 1, kind: input, shape index: {}]   ;;  %s971_s5 = inlined_call_operand.vmem [shape: f32[8,81], index: 5, kind: output, shape index: {}]  }
   0x1   :  { %v20_v0 = vld [vmem:[%s966_s0] sm:$0xff]  ;;  %698 = vmatprep.subr.bf16.mxu0 %v785_v1  ;;  %710 = vmatprep.subr.bf16.mxu1 %v785_v1  ;;  %s788_s22 = smov 1   ;;  %s789_s23 = smov 11   ;;  %v528_v36 = vld [vmem:[%s967_s2 + $0x8] sm:$0xff]  ;;  %v532_v58 = vld [vmem:[%s967_s2 + $0x10] sm:$0xff]  ;;  %vm521_vm6 = vcmask 662528  }
   0x2   :  { %25 = vrot.lane.b32.xlu1 %v20_v0, %s786_s20  ;;  %21 = vrot.lane.b32.xlu0 %v20_v0, %s787_s21  ;;  %s790_s24 = smov 127   ;;  %s791_s0 = smov 118   ;;  %v37_v15 = vld [vmem:[%s967_s2] sm:$0xff]  ;;  %v529_v38 = vld [vmem:[%s968_s3 + $0x8] sm:$0xff] }
   0x3   :  { %611 = vmatprep.mubr.msk.f32.mxu0 %vm792_vm0, %v793_v2  ;;  %632 = vmatprep.mubr.msk.f32.mxu1 %vm792_vm0, %v793_v2  ;;  %s794_s25 = smov 117   ;;  %s795_s26 = smov 116   ;;  %v38_v16 = vld [vmem:[%s968_s3] sm:$0xff]  ;;  %v531_v43 = vld [vmem:[%s969_s4 + $0x8] sm:$0xff]  ;;  %v533_v60 = vld [vmem:[%s968_s3 + $0x10] sm:$0xff] }
   0x4   :  { %v116_v21 = vld [vmem:[%s969_s4] sm:$0xff]  ;;  %s796_s8 = smov 8   ;;  %s797_s9 = smov 114  }
   0x5   :  { %s798_s10 = smov 94   ;;  %s799_s11 = smov 96  }
   0x6   :  { %27 = vrot.lane.b32.xlu1 %v20_v0, %s788_s22  ;;  %23 = vrot.lane.b32.xlu0 %v20_v0, %s789_s23  ;;  %s800_s12 = smov 92   ;;  %s801_s19 = smov 9  }
   0x7   :  { %s802_s27 = smov 107   ;;  %s803_s28 = smov 6  }
   0x8   :  { %s804_s29 = smov 101   ;;  %s805_s30 = smov 104  }
   0x9   :  { %s806_s6 = smov 71   ;;  %s807_s7 = smov 74  }
   0xa   :  { %29 = vrot.lane.b32.xlu0 %v20_v0, %s790_s24  ;;  %31 = vrot.lane.b32.xlu1 %v20_v0, %s791_s0  ;;  %s808_s13 = smov 68  }
   0xe   :  { %33 = vrot.lane.b32.xlu0 %v20_v0, %s794_s25  ;;  %35 = vrot.lane.b32.xlu1 %v20_v0, %s795_s26 }
  0x74   :  { %v26_v3 = vpop.permute.xlu1 %25  ;;  %v22_v4 = vpop.permute.xlu0 %21 }
  0x78   :  { %v24_v5 = vpop.permute.xlu0 %23  ;;  %v28_v7 = vpop.permute.xlu1 %27 }
  0x79   :  { %v699_v6 = vpack.c.bf16 %v24_v5, %v22_v4  ;;  %v702_v9 = vpack.c.bf16 %v28_v7, %v26_v3  ;;  %v535_v3 = vld [vmem:[%s969_s4 + $0x10] sm:$0xff] }
  0x7b   :  { %700 = vmatpush3.bf16.msra.mxu0 %v699_v6 }
  0x7c   :  { %701 = vmatprep.subr.bf16.mxu0 %v785_v1  ;;  %v30_v8 = vpop.permute.xlu0 %29  ;;  %v32_v11 = vpop.permute.xlu1 %31 }
  0x7d   :  { %v705_v10 = vpack.c.bf16 %v30_v8, %v20_v0 }
  0x7f   :  { %703 = vmatpush3.bf16.msra.mxu0 %v702_v9 }
  0x80   :  { %704 = vmatprep.subr.bf16.mxu0 %v785_v1  ;;  %v34_v12 = vpop.permute.xlu0 %33  ;;  %v36_v14 = vpop.permute.xlu1 %35 }
  0x81   :  { %v708_v13 = vpack.c.bf16 %v34_v12, %v32_v11 }
  0x83   :  { %706 = vmatpush3.bf16.msra.mxu0 %v705_v10 }
  0x84   :  { %707 = vmatprep.subr.bf16.mxu0 %v785_v1 }
  0x87   :  { %709 = vmatpush3.bf16.msra.mxu0 %v708_v13 }
  0x88   :  { %609 = vmatprep.subr.mxu0 %v793_v2 }
  0x8b   :  { %610 = vmatpush3.msra.mxu0 %v36_v14 }
  0x8c   :  { %612 = vmatmul.mubr.msk.f32.vlgmr.msra.gmra.mrb[0].mxu0 %vm39_vm1, %v37_v15  ;;  %722 = vmatprep.subr.bf16.mxu0 %v785_v1 }
  0x8d   :  { %653 = vmatprep.mubr.msk.f32.mxu0 %vm792_vm0, %v793_v2 }
 0x15f   :  { %v109_v17 = vpop.f32.mrb[0].mxu0 }
 0x160   :  { %v110_v18 = vadd.f32 %v109_v17, %v38_v16  ;;  %v613_v19 = vpop.f32.mrb[1].mxu0 }
 0x162   :  { %vm113_vm2 = vcmp.ge.f32.partialorder %v110_v18, 0.0  ;;  %v114_v20 = vmul.f32 0.01, %v110_v18 }
 0x164   :  { %v115_v22 = vsel %vm113_vm2, %v110_v18, %v114_v20  ;;  %v536_v18 = vld [vmem:[%s967_s2 + $0x18] sm:$0xff] }
 0x165   :  { %v117_v23 = vmul.f32 %v116_v21, %v115_v22  ;;  %v537_v20 = vld [vmem:[%s968_s3 + $0x18] sm:$0xff] }
 0x167   :  { %120 = vrot.lane.b32.xlu1 %v117_v23, %s786_s20  ;;  %118 = vrot.lane.b32.xlu0 %v117_v23, %s787_s21 }
 0x16b   :  { %124 = vrot.lane.b32.xlu1 %v117_v23, %s791_s0  ;;  %122 = vrot.lane.b32.xlu0 %v117_v23, %s796_s8 }
 0x16f   :  { %128 = vrot.lane.b32.xlu1 %v117_v23, %s797_s9  ;;  %126 = vrot.lane.b32.xlu0 %v117_v23, %s795_s26 }
 0x173   :  { %132 = vrot.lane.b32.xlu1 %v117_v23, %s798_s10  ;;  %130 = vrot.lane.b32.xlu0 %v117_v23, %s799_s11 }
 0x177   :  { %134 = vrot.lane.b32.xlu0 %v117_v23, %s800_s12 }
 0x1d9   :  { %v121_v24 = vpop.permute.xlu1 %120  ;;  %v119_v25 = vpop.permute.xlu0 %118 }
 0x1da   :  { %v711_v26 = vpack.c.bf16 %v121_v24, %v119_v25  ;;  %v539_v25 = vld [vmem:[%s969_s4 + $0x18] sm:$0xff] }
 0x1dc   :  { %712 = vmatpush3.bf16.msra.mxu1 %v711_v26 }
 0x1dd   :  { %v125_v27 = vpop.permute.xlu1 %124  ;;  %v123_v28 = vpop.permute.xlu0 %122  ;;  %713 = vmatprep.subr.bf16.mxu1 %v785_v1 }
 0x1de   :  { %v714_v29 = vpack.c.bf16 %v125_v27, %v123_v28 }
 0x1e0   :  { %715 = vmatpush3.bf16.msra.mxu1 %v714_v29 }
 0x1e1   :  { %v129_v30 = vpop.permute.xlu1 %128  ;;  %v127_v31 = vpop.permute.xlu0 %126  ;;  %716 = vmatprep.subr.bf16.mxu1 %v785_v1 }
 0x1e2   :  { %v717_v32 = vpack.c.bf16 %v129_v30, %v127_v31 }
 0x1e4   :  { %718 = vmatpush3.bf16.msra.mxu1 %v717_v32 }
 0x1e5   :  { %v133_v33 = vpop.permute.xlu1 %132  ;;  %v131_v34 = vpop.permute.xlu0 %130  ;;  %719 = vmatprep.subr.bf16.mxu1 %v785_v1 }
 0x1e6   :  { %v720_v35 = vpack.c.bf16 %v133_v33, %v131_v34 }
 0x1e8   :  { %721 = vmatpush3.bf16.msra.mxu1 %v720_v35 }
 0x1e9   :  { %630 = vmatprep.subr.mxu1 %v793_v2  ;;  %v135_v37 = vpop.permute.xlu0 %134 }
 0x1ec   :  { %631 = vmatpush3.msra.mxu1 %v135_v37 }
 0x1ed   :  { %633 = vmatmul.mubr.msk.f32.vlgmr.msra.gmra.mrb[0].mxu1 %vm39_vm1, %v528_v36  ;;  %734 = vmatprep.subr.bf16.mxu1 %v785_v1 }
 0x1ee   :  { %674 = vmatprep.mubr.msk.f32.mxu1 %vm792_vm0, %v793_v2 }
 0x2c0   :  { %v209_v39 = vpop.f32.mrb[0].mxu1 }
 0x2c1   :  { %v210_v40 = vadd.f32 %v529_v38, %v209_v39  ;;  %v634_v41 = vpop.f32.mrb[1].mxu1  ;;  %v540_v39 = vld [vmem:[%s967_s2 + $0x20] sm:$0xff] }
 0x2c2   :  { %v809_v41 = vmov 12  }
 0x2c3   :  { %vm213_vm3 = vcmp.ge.f32.partialorder %v210_v40, 0.0  ;;  %v214_v42 = vmul.f32 0.01, %v210_v40  ;;  %783 = vset.pattern.permute.xlu1 %v809_v41  ;;  %784 = vset.pattern.permute.xlu0 %v809_v41 }
 0x2c5   :  { %v215_v44 = vsel %vm213_vm3, %v210_v40, %v214_v42  ;;  %v541_v42 = vld [vmem:[%s968_s3 + $0x20] sm:$0xff] }
 0x2c6   :  { %v218_v45 = vmul.f32 %v531_v43, %v215_v44 }
 0x2c8   :  { %221 = vrot.lane.b32.xlu0 %v218_v45, %s801_s19  ;;  %219 = vrot.lane.b32.xlu1 %v218_v45, %s787_s21 }
 0x2cc   :  { %225 = vrot.lane.b32.xlu0 %v218_v45, %s802_s27  ;;  %223 = vrot.lane.b32.xlu1 %v218_v45, %s803_s28 }
 0x2d0   :  { %229 = vrot.lane.b32.xlu0 %v218_v45, %s804_s29  ;;  %227 = vrot.lane.b32.xlu1 %v218_v45, %s805_s30 }
 0x2d4   :  { %233 = vrot.lane.b32.xlu0 %v218_v45, %s806_s6  ;;  %231 = vrot.lane.b32.xlu1 %v218_v45, %s807_s7 }
 0x2d8   :  { %235 = vrot.lane.b32.xlu1 %v218_v45, %s808_s13 }
 0x33a   :  { %v222_v46 = vpop.permute.xlu0 %221  ;;  %v220_v47 = vpop.permute.xlu1 %219 }
 0x33b   :  { %v723_v48 = vpack.c.bf16 %v222_v46, %v220_v47 }
 0x33d   :  { %724 = vmatpush3.bf16.msra.mxu0 %v723_v48 }
 0x33e   :  { %v226_v49 = vpop.permute.xlu0 %225  ;;  %v224_v50 = vpop.permute.xlu1 %223  ;;  %725 = vmatprep.subr.bf16.mxu0 %v785_v1 }
 0x33f   :  { %v726_v51 = vpack.c.bf16 %v226_v49, %v224_v50 }
 0x341   :  { %727 = vmatpush3.bf16.msra.mxu0 %v726_v51 }
 0x342   :  { %v230_v52 = vpop.permute.xlu0 %229  ;;  %v228_v53 = vpop.permute.xlu1 %227  ;;  %728 = vmatprep.subr.bf16.mxu0 %v785_v1 }
 0x343   :  { %v729_v54 = vpack.c.bf16 %v230_v52, %v228_v53 }
 0x345   :  { %730 = vmatpush3.bf16.msra.mxu0 %v729_v54 }
 0x346   :  { %v234_v55 = vpop.permute.xlu0 %233  ;;  %v232_v56 = vpop.permute.xlu1 %231  ;;  %731 = vmatprep.subr.bf16.mxu0 %v785_v1 }
 0x347   :  { %v732_v57 = vpack.c.bf16 %v234_v55, %v232_v56 }
 0x349   :  { %733 = vmatpush3.bf16.msra.mxu0 %v732_v57 }
 0x34a   :  { %651 = vmatprep.subr.mxu0 %v793_v2  ;;  %v236_v59 = vpop.permute.xlu1 %235 }
 0x34d   :  { %652 = vmatpush3.msra.mxu0 %v236_v59 }
 0x34e   :  { %654 = vmatmul.mubr.msk.f32.vlgmr.msra.gmra.mrb[2].mxu0 %vm39_vm1, %v532_v58  ;;  %746 = vmatprep.subr.bf16.mxu0 %v785_v1 }
 0x34f   :  { %695 = vmatprep.mubr.msk.f32.mxu0 %vm792_vm0, %v793_v2 }
 0x421   :  { %v310_v61 = vpop.f32.mrb[2].mxu0 }
 0x422   :  { %v311_v62 = vadd.f32 %v533_v60, %v310_v61  ;;  %v655_v63 = vpop.f32.mrb[3].mxu0 }
 0x424   :  { %vm314_vm4 = vcmp.ge.f32.partialorder %v311_v62, 0.0  ;;  %v315_v0 = vmul.f32 0.01, %v311_v62 }
 0x426   :  { %v316_v4 = vsel %vm314_vm4, %v311_v62, %v315_v0 }
 0x427   :  { %v319_v5 = vmul.f32 %v535_v3, %v316_v4 }
 0x429   :  { %322 = vrot.lane.b32.xlu1 %v319_v5, %s786_s20  ;;  %320 = vrot.lane.b32.xlu0 %v319_v5, %s787_s21 }
 0x42d   :  { %326 = vrot.lane.b32.xlu1 %v319_v5, %s791_s0  ;;  %324 = vrot.lane.b32.xlu0 %v319_v5, %s796_s8 }
 0x431   :  { %330 = vrot.lane.b32.xlu1 %v319_v5, %s797_s9  ;;  %328 = vrot.lane.b32.xlu0 %v319_v5, %s795_s26 }
 0x435   :  { %334 = vrot.lane.b32.xlu1 %v319_v5, %s798_s10  ;;  %332 = vrot.lane.b32.xlu0 %v319_v5, %s799_s11 }
 0x439   :  { %336 = vrot.lane.b32.xlu0 %v319_v5, %s800_s12 }
 0x49b   :  { %v323_v6 = vpop.permute.xlu1 %322  ;;  %v321_v7 = vpop.permute.xlu0 %320 }
 0x49c   :  { %v735_v8 = vpack.c.bf16 %v323_v6, %v321_v7 }
 0x49e   :  { %736 = vmatpush3.bf16.msra.mxu1 %v735_v8 }
 0x49f   :  { %v327_v9 = vpop.permute.xlu1 %326  ;;  %v325_v10 = vpop.permute.xlu0 %324  ;;  %737 = vmatprep.subr.bf16.mxu1 %v785_v1 }
 0x4a0   :  { %v738_v11 = vpack.c.bf16 %v327_v9, %v325_v10 }
 0x4a2   :  { %739 = vmatpush3.bf16.msra.mxu1 %v738_v11 }
 0x4a3   :  { %v331_v12 = vpop.permute.xlu1 %330  ;;  %v329_v13 = vpop.permute.xlu0 %328  ;;  %740 = vmatprep.subr.bf16.mxu1 %v785_v1 }
 0x4a4   :  { %v741_v14 = vpack.c.bf16 %v331_v12, %v329_v13 }
 0x4a6   :  { %742 = vmatpush3.bf16.msra.mxu1 %v741_v14 }
 0x4a7   :  { %v335_v15 = vpop.permute.xlu1 %334  ;;  %v333_v16 = vpop.permute.xlu0 %332  ;;  %743 = vmatprep.subr.bf16.mxu1 %v785_v1 }
 0x4a8   :  { %v744_v17 = vpack.c.bf16 %v335_v15, %v333_v16 }
 0x4aa   :  { %745 = vmatpush3.bf16.msra.mxu1 %v744_v17 }
 0x4ab   :  { %672 = vmatprep.subr.mxu1 %v793_v2  ;;  %v337_v19 = vpop.permute.xlu0 %336 }
 0x4ae   :  { %673 = vmatpush3.msra.mxu1 %v337_v19 }
 0x4af   :  { %675 = vmatmul.mubr.msk.f32.vlgmr.msra.gmra.mrb[2].mxu1 %vm39_vm1, %v536_v18 }
 0x582   :  { %v411_v21 = vpop.f32.mrb[2].mxu1 }
 0x583   :  { %v412_v22 = vadd.f32 %v537_v20, %v411_v21  ;;  %v676_v23 = vpop.f32.mrb[3].mxu1 }
 0x585   :  { %vm415_vm5 = vcmp.ge.f32.partialorder %v412_v22, 0.0  ;;  %v416_v24 = vmul.f32 0.01, %v412_v22 }
 0x587   :  { %v417_v26 = vsel %vm415_vm5, %v412_v22, %v416_v24 }
 0x588   :  { %v420_v27 = vmul.f32 %v539_v25, %v417_v26 }
 0x58a   :  { %423 = vrot.lane.b32.xlu0 %v420_v27, %s789_s23  ;;  %421 = vrot.lane.b32.xlu1 %v420_v27, %s787_s21 }
 0x58e   :  { %427 = vrot.lane.b32.xlu0 %v420_v27, %s788_s22  ;;  %425 = vrot.lane.b32.xlu1 %v420_v27, %s786_s20 }
 0x592   :  { %431 = vrot.lane.b32.xlu0 %v420_v27, %s791_s0  ;;  %429 = vrot.lane.b32.xlu1 %v420_v27, %s790_s24 }
 0x596   :  { %435 = vrot.lane.b32.xlu0 %v420_v27, %s795_s26  ;;  %433 = vrot.lane.b32.xlu1 %v420_v27, %s794_s25 }
 0x5fc   :  { %v424_v28 = vpop.permute.xlu0 %423  ;;  %v422_v29 = vpop.permute.xlu1 %421 }
 0x5fd   :  { %v747_v30 = vpack.c.bf16 %v424_v28, %v422_v29 }
 0x5ff   :  { %748 = vmatpush3.bf16.msra.mxu0 %v747_v30 }
 0x600   :  { %v428_v31 = vpop.permute.xlu0 %427  ;;  %v426_v32 = vpop.permute.xlu1 %425  ;;  %749 = vmatprep.subr.bf16.mxu0 %v785_v1 }
 0x601   :  { %v750_v33 = vpack.c.bf16 %v428_v31, %v426_v32 }
 0x603   :  { %751 = vmatpush3.bf16.msra.mxu0 %v750_v33 }
 0x604   :  { %v430_v34 = vpop.permute.xlu1 %429  ;;  %752 = vmatprep.subr.bf16.mxu0 %v785_v1  ;;  %v432_v36 = vpop.permute.xlu0 %431 }
 0x605   :  { %v753_v35 = vpack.c.bf16 %v430_v34, %v420_v27 }
 0x607   :  { %754 = vmatpush3.bf16.msra.mxu0 %v753_v35 }
 0x608   :  { %v434_v37 = vpop.permute.xlu1 %433  ;;  %755 = vmatprep.subr.bf16.mxu0 %v785_v1  ;;  %v436_v40 = vpop.permute.xlu0 %435 }
 0x609   :  { %v756_v38 = vpack.c.bf16 %v434_v37, %v432_v36 }
 0x60b   :  { %757 = vmatpush3.bf16.msra.mxu0 %v756_v38 }
 0x60c   :  { %693 = vmatprep.subr.mxu0 %v793_v2  ;;  %v514_v2 = vld [vmem:[%s970_s1] sm:$0xff] }
 0x60f   :  { %694 = vmatpush3.msra.mxu0 %v436_v40 }
 0x610   :  { %696 = vmatmul.mubr.msk.f32.vlgmr.msra.gmra.mrb[4].mxu0 %vm39_vm1, %v540_v39 }
 0x6e3   :  { %v510_v1 = vpop.f32.mrb[4].mxu0 }
 0x6e4   :  { %v511_v43 = vadd.f32 %v541_v42, %v510_v1  ;;  %v697_v44 = vpop.f32.mrb[5].mxu0 }
 0x6e6   :  { %517 = vperm.xlu1 %783, %v511_v43  }
 0x765   :  { %v518_v45 = vpop.permute.xlu1 %517 }
 0x766   :  { %v520_v46 = vadd.f32 %v518_v45, %v514_v2 }
 0x768   :  { %522 = vst.msk [vmem:[%s971_s5] sm:$0xff] %vm521_vm6, %v520_v46 }

</bundles_post_ra>
